<compile_context>
chip_gen: v5e
topology: v5e:2x2
jax: 0.10.0
libtpu: 0.0.40
codegen_flags: <defaults>
</compile_context>

<pallas_src>
import functools

import jax
import jax.numpy as jnp
from jax.experimental import pallas as pl
from jax.experimental.pallas import tpu as pltpu

EMBED_DIM = 64
NUM_CLASSES = 10
LANE = 128


# --------------------------------- kernel -----------------------------------
def linear_classifier_kernel(x_ref, w_ref, b_ref, o_ref):
    # x_ref : (TB, N, E)   activation tile (widened to f32 in-kernel)
    # w_ref : (E, C_pad)   (W.T / N): pre-transposed, 1/N-folded, lane-padded
    # b_ref : (1, C_pad)   bias, lane-padded
    # o_ref : (TB, C_pad)  lane-dense output tile (full 128-lane stores)
    x = x_ref[...].astype(jnp.float32)
    pooled = jnp.sum(x, axis=1)                                 # (TB, E); 1/N is in w_ref
    y = jnp.dot(pooled, w_ref[...],
                preferred_element_type=jnp.float32)             # (TB, C_pad) on MXU
    o_ref[...] = y + b_ref[...]


# ------------------------- one-time parameter prep ---------------------------
def prepare_params(w, b, seq_len):
    """Host-side, once at model init: fold 1/N into W, transpose, lane-pad.

    NOTE: w_t bakes in 1/seq_len; rebuild it if the sequence length changes.
    """
    C, E = w.shape
    c_pad = ((C + LANE - 1) // LANE) * LANE                     # pad classes -> 128
    w_t = jnp.zeros((E, c_pad), jnp.float32).at[:, :C].set(
        w.T.astype(jnp.float32) * (1.0 / seq_len))
    b_p = jnp.zeros((1, c_pad), jnp.float32).at[:, :C].set(b.astype(jnp.float32))
    return w_t, b_p


# ------------------------------ host wrapper ---------------------------------
@functools.partial(jax.jit, static_argnames=("num_classes",))
def linear_classifier_forward(x, w_t, b_p, num_classes=NUM_CLASSES):
    """x: (B, N, E) activations; w_t/b_p from prepare_params()."""
    B, N, E = x.shape
    c_pad = w_t.shape[1]

    # B-tiled grid: full batch at small B (one DMA, one step), 128-row tiles at
    # large B so the default 2-deep pipeline hides the x DMA and VMEM stays
    # bounded (~2*TB*N*E*4 B) well under v5e's 16 MiB scoped default.
    TB = B if B <= 128 else 128
    grid = (pl.cdiv(B, TB),)

    out = pl.pallas_call(
        linear_classifier_kernel,
        out_shape=jax.ShapeDtypeStruct((B, c_pad), jnp.float32),
        grid=grid,
        in_specs=[
            pl.BlockSpec((TB, N, E), lambda i: (i, 0, 0)),
            pl.BlockSpec((E, c_pad), lambda i: (0, 0)),
            pl.BlockSpec((1, c_pad), lambda i: (0, 0)),
        ],
        out_specs=pl.BlockSpec((TB, c_pad), lambda i: (i, 0)),
        compiler_params=pltpu.CompilerParams(
            dimension_semantics=("parallel",)),                 # v7x: both TCs
    )(x, w_t, b_p)

    # slice back to the real number of classes (free layout plumbing)
    return out[:, :num_classes]


# -------------------------- pure-JAX reference (check) ------------------------
def linear_classifier_reference(x, w, b):
    pooled = jnp.mean(x.astype(jnp.float32), axis=1)            # (B, E)
    return jnp.einsum('be,ce->bc', pooled, w.astype(jnp.float32),
                      precision=jax.lax.Precision.HIGHEST) + b.astype(jnp.float32)


# ----------------------------------- main -------------------------------------
if __name__ == "__main__":
    key = jax.random.PRNGKey(0)
    kx, kw, kb = jax.random.split(key, 3)

    B, N = 8, 16                                                # small demo shapes
    x = jax.random.normal(kx, (B, N, EMBED_DIM), dtype=jnp.float32)
    w = 0.05 * jax.random.normal(kw, (NUM_CLASSES, EMBED_DIM), dtype=jnp.float32)
    b = 0.02 * jax.random.normal(kb, (NUM_CLASSES,), dtype=jnp.float32)

    # hoisted out of the per-call path: done once at "init"
    w_t, b_p = prepare_params(w, b, seq_len=N)

    out = jax.block_until_ready(
        linear_classifier_forward(x, w_t, b_p, num_classes=NUM_CLASSES))
    assert out.shape == (B, NUM_CLASSES), out.shape

    ref = linear_classifier_reference(x, w, b)
    max_err = float(jnp.max(jnp.abs(out - ref)))
    assert jnp.allclose(out, ref, atol=1e-4, rtol=1e-4), f"max abs err {max_err}"

    print("KERNEL_OK")
</pallas_src>

<mosaic_0001>
module attributes {stable_mosaic.version = 11 : i64} {
  func.func @linear_classifier_kernel(%arg0: i32, %arg1: memref<8x16x64xf32, #tpu.memory_space<vmem>>, %arg2: memref<64x128xf32, #tpu.memory_space<vmem>>, %arg3: memref<1x128xf32, #tpu.memory_space<vmem>>, %arg4: memref<8x128xf32, #tpu.memory_space<vmem>>) attributes {dimension_semantics = [#tpu.dimension_semantics<parallel>], iteration_bounds = array<i64: 1>, scalar_prefetch = 0 : i64, scratch_operands = 0 : i64, tpu.core_type = #tpu.core_type<tc>, window_params = [{transform_indices = @transform_0, window_bounds = array<i64: 8, 16, 64>}, {pipeline_mode = #tpu.pipeline_mode<synchronous>, transform_indices = @transform_1, window_bounds = array<i64: 64, 128>}, {pipeline_mode = #tpu.pipeline_mode<synchronous>, transform_indices = @transform_2, window_bounds = array<i64: 1, 128>}, {transform_indices = @transform_3, window_bounds = array<i64: 8, 128>}]} {
    %c0 = arith.constant 0 : index
    %c0_0 = arith.constant 0 : index
    %c0_1 = arith.constant 0 : index
    %0 = vector.load %arg1[%c0, %c0_0, %c0_1] : memref<8x16x64xf32, #tpu.memory_space<vmem>>, vector<8x16x64xf32>
    %cst = arith.constant dense<0.000000e+00> : vector<8x64xf32>
    %1 = vector.multi_reduction <add>, %0, %cst [1] : vector<8x16x64xf32> to vector<8x64xf32>
    %c0_2 = arith.constant 0 : index
    %c0_3 = arith.constant 0 : index
    %2 = vector.load %arg2[%c0_2, %c0_3] : memref<64x128xf32, #tpu.memory_space<vmem>>, vector<64x128xf32>
    %cst_4 = arith.constant dense<0.000000e+00> : vector<8x128xf32>
    %3 = tpu.matmul %1, %2, %cst_4 {dimension_numbers = #tpu.dot_dimension_numbers<[1], [0], [0], [1], [0, 0, 1, 1], [], []>} : vector<8x64xf32>, vector<64x128xf32>, vector<8x128xf32> -> vector<8x128xf32>
    %c0_5 = arith.constant 0 : index
    %c0_6 = arith.constant 0 : index
    %4 = vector.load %arg3[%c0_5, %c0_6] : memref<1x128xf32, #tpu.memory_space<vmem>>, vector<1x128xf32>
    %5 = vector.broadcast %4 : vector<1x128xf32> to vector<8x128xf32>
    %6 = arith.addf %3, %5 : vector<8x128xf32>
    %c0_7 = arith.constant 0 : index
    %c0_8 = arith.constant 0 : index
    %7 = vector.load %arg4[%c0_7, %c0_8] : memref<8x128xf32, #tpu.memory_space<vmem>>, vector<8x128xf32>
    tpu.vector_store %arg4[%c0_7, %c0_8], %6 {strides = array<i32>} : memref<8x128xf32, #tpu.memory_space<vmem>>, vector<8x128xf32>,
    return
  }
  func.func @transform_0(%arg0: i32) -> (i32, i32, i32) {
    %c0_i32 = arith.constant 0 : i32
    %c0_i32_0 = arith.constant 0 : i32
    %c0_i32_1 = arith.constant 0 : i32
    return %arg0, %c0_i32, %c0_i32_0 : i32, i32, i32
  }
  func.func @transform_1(%arg0: i32) -> (i32, i32) {
    %c0_i32 = arith.constant 0 : i32
    %c0_i32_0 = arith.constant 0 : i32
    %c0_i32_1 = arith.constant 0 : i32
    return %c0_i32, %c0_i32_0 : i32, i32
  }
  func.func @transform_2(%arg0: i32) -> (i32, i32) {
    %c0_i32 = arith.constant 0 : i32
    %c0_i32_0 = arith.constant 0 : i32
    %c0_i32_1 = arith.constant 0 : i32
    return %c0_i32, %c0_i32_0 : i32, i32
  }
  func.func @transform_3(%arg0: i32) -> (i32, i32) {
    %c0_i32 = arith.constant 0 : i32
    %c0_i32_0 = arith.constant 0 : i32
    return %arg0, %c0_i32 : i32, i32
  }
}

</mosaic_0001>

<bundles_post_ra>
// kernel: linear_classifier_forward.1
= control target key start
LH: loop header
LB: loop body
LE: loop exit
PB: predicated region body
PF: predicated region fallthrough
CT: control target
= control target key end

     0   :  { %8 = vsyncpa [#allocation3], 0  ;;  %s353_s0 = inlined_call_operand.hbm [shape: f32[8,16,64], index: 0, kind: input, shape index: {}]   ;;  %s354_s1 = inlined_call_operand.hbm [shape: f32[64,128], index: 1, kind: input, shape index: {}]   ;;  %s355_s2 = inlined_call_operand.vmem [shape: f32[1,128], index: 2, kind: input, shape index: {}]   ;;  %s356_s3 = inlined_call_operand.hbm [shape: f32[8,128], index: 3, kind: output, shape index: {}]  }
   0x1   :  { %9 = vsyncpa [#allocation6], 0 }
   0x2   :  { %10 = vsyncpa [#allocation4], 0  ;;  %s15_s14 = sshll.u32 %s353_s0, 4  ;;  %s296_s15 = smov [#allocation2]   ;;  %s16_s14 = int_to_ptr.hbm [resolvable:$true] %s15_s14 }
   0x3   :  { %s17_s16 = sshll.u32 %s296_s15, 4  ;;  %s28_s19 = sshll.u32 %s354_s1, 4  ;;  %s18_s16 = int_to_ptr.vmem [resolvable:$true] %s17_s16  ;;  %s29_s19 = int_to_ptr.hbm [resolvable:$true] %s28_s19 }
   0x4   :  { %s297_s20 = smov 128   ;;  %s298_s21 = smov 8  }
   0x5   :  { %23 = dma.hbm_to_vmem [thread:$0]  %s16_s14, 2048, %s18_s16, [#allocation3], %s297_s20, %s297_s20, %s298_s21  }
   0x6   :  { %s299_s22 = smov [#allocation5]  }
   0x7   :  { %s30_s23 = sshll.u32 %s299_s22, 4  ;;  %s31_s23 = int_to_ptr.vmem [resolvable:$true] %s30_s23 }
   0x8   :  { %36 = dma.hbm_to_vmem [thread:$0]  %s29_s19, 1024, %s31_s23, [#allocation6], %s297_s20, %s297_s20, %s298_s21  }
   0x9   :  { %290 = dma.done.wait [#allocation3], 2048  }
   0xa   :  { %291 = vsyncadd [#allocation3], 4294965248 }
   0xb   :  { %292 = dma.done.wait [#allocation6], 1024  }
   0xc   :  { %293 = vsyncadd [#allocation6], 4294966272  ;;  %v143_v0 = vld [vmem:[#allocation5 + $0x38] sm:$0xff]  ;;  %v142_v1 = vld [vmem:[#allocation5 + $0x30] sm:$0xff]  ;;  %vm63_vm0 = vcmask 523264   ;;  %vm156_vm1 = vcmask 1041409  }
   0xd   :  { %180 = vmatpush.msra.mxu0 %v143_v0  ;;  %v141_v2 = vld [vmem:[#allocation5 + $0x28] sm:$0xff]  ;;  %v140_v3 = vld [vmem:[#allocation5 + $0x20] sm:$0xff]  ;;  %v49_v6 = vld [vmem:[#allocation2 + $0x10] sm:$0xff]  ;;  %vm158_vm2 = vcmask 1042434   ;;  %vm160_vm3 = vcmask 1043459   ;;  %vm162_vm4 = vcmask 1044484  }
   0xe   :  { %v47_v4 = vld [vmem:[#allocation2] sm:$0xff]  ;;  %v48_v5 = vld [vmem:[#allocation2 + $0x8] sm:$0xff]  ;;  %v50_v7 = vld [vmem:[#allocation2 + $0x18] sm:$0xff]  ;;  %v73_v13 = vsel %vm63_vm0, %v49_v6, 0.0  ;;  %vm164_vm5 = vcmask 1045509   ;;  %vm166_vm6 = vcmask 1046534  }
   0xf   :  { %181 = vmatpush.msra.mxu0 %v142_v1  ;;  %v64_v8 = vsel %vm63_vm0, %v47_v4, 0.0  ;;  %v51_v9 = vld [vmem:[#allocation2 + $0x20] sm:$0xff]  ;;  %v52_v10 = vld [vmem:[#allocation2 + $0x28] sm:$0xff]  ;;  %v53_v11 = vld [vmem:[#allocation2 + $0x30] sm:$0xff]  ;;  %v65_v12 = vsel %vm63_vm0, %v48_v5, 0.0  ;;  %v74_v14 = vsel %vm63_vm0, %v50_v7, 0.0 }
  0x10   :  { %v54_v15 = vld [vmem:[#allocation2 + $0x38] sm:$0xff]  ;;  %v55_v16 = vld [vmem:[#allocation2 + $0x40] sm:$0xff]  ;;  %v56_v17 = vld [vmem:[#allocation2 + $0x48] sm:$0xff]  ;;  %v66_v18 = vadd.f32 %v65_v12, %v64_v8  ;;  %v75_v19 = vadd.f32 %v74_v14, %v73_v13  ;;  %v82_v20 = vsel %vm63_vm0, %v51_v9, 0.0  ;;  %v83_v21 = vsel %vm63_vm0, %v52_v10, 0.0  ;;  %s300_s24 = smov [#allocation7]  }
  0x11   :  { %182 = vmatpush.msra.mxu0 %v141_v2  ;;  %v139_v22 = vld [vmem:[#allocation5 + $0x18] sm:$0xff]  ;;  %v57_v23 = vld [vmem:[#allocation2 + $0x50] sm:$0xff]  ;;  %v84_v25 = vadd.f32 %v83_v21, %v82_v20  ;;  %v91_v26 = vsel %vm63_vm0, %v53_v11, 0.0  ;;  %v92_v27 = vsel %vm63_vm0, %v54_v15, 0.0  ;;  %v100_v28 = vsel %vm63_vm0, %v55_v16, 0.0  ;;  %v59_v29 = vld [vmem:[#allocation2 + $0x60] sm:$0xff] }
  0x12   :  { %v58_v24 = vld [vmem:[#allocation2 + $0x58] sm:$0xff]  ;;  %v60_v30 = vld [vmem:[#allocation2 + $0x68] sm:$0xff]  ;;  %v67_v31 = vrot.slane %v66_v18, 4  ;;  %v76_v32 = vrot.slane %v75_v19, 4  ;;  %v93_v33 = vadd.f32 %v92_v27, %v91_v26  ;;  %v101_v34 = vsel %vm63_vm0, %v56_v17, 0.0  ;;  %v138_v35 = vld [vmem:[#allocation5 + $0x10] sm:$0xff] }
  0x13   :  { %183 = vmatpush.msra.mxu0 %v140_v3  ;;  %v85_v36 = vrot.slane %v84_v25, 4  ;;  %v102_v37 = vadd.f32 %v101_v34, %v100_v28  ;;  %v109_v38 = vsel %vm63_vm0, %v57_v23, 0.0  ;;  %v110_v39 = vsel %vm63_vm0, %v58_v24, 0.0  ;;  %v61_v40 = vld [vmem:[#allocation2 + $0x70] sm:$0xff]  ;;  %v137_v45 = vld [vmem:[#allocation5 + $0x8] sm:$0xff]  ;;  %v62_v50 = vld [vmem:[#allocation2 + $0x78] sm:$0xff] }
  0x14   :  { %v68_v41 = vadd.f32 %v67_v31, %v66_v18  ;;  %v77_v42 = vadd.f32 %v76_v32, %v75_v19  ;;  %v94_v43 = vrot.slane %v93_v33, 4  ;;  %v111_v44 = vadd.f32 %v110_v39, %v109_v38  ;;  %v136_v55 = vld [vmem:[#allocation5] sm:$0xff]  ;;  %s198_s25 = sshll.u32 %s300_s24, 4  ;;  %s200_s28 = sshll.u32 %s356_s3, 4  ;;  %s199_s25 = int_to_ptr.vmem [resolvable:$true] %s198_s25  ;;  %s201_s28 = int_to_ptr.hbm [resolvable:$true] %s200_s28 }
  0x15   :  { %184 = vmatpush.msra.mxu0 %v139_v22  ;;  %v86_v46 = vadd.f32 %v85_v36, %v84_v25  ;;  %v103_v47 = vrot.slane %v102_v37, 4  ;;  %v118_v48 = vsel %vm63_vm0, %v59_v29, 0.0  ;;  %v119_v49 = vsel %vm63_vm0, %v60_v30, 0.0  ;;  %v217_v39 = vld [vmem:[%s355_s2] ss:$0 sm:$0xff] }
  0x16   :  { %v69_v51 = vrot.slane %v68_v41, 2  ;;  %v78_v52 = vrot.slane %v77_v42, 2  ;;  %v95_v53 = vadd.f32 %v94_v43, %v93_v33  ;;  %v112_v54 = vrot.slane %v111_v44, 4 }
  0x17   :  { %185 = vmatpush.msra.mxu0 %v138_v35  ;;  %v87_v56 = vrot.slane %v86_v46, 2  ;;  %v104_v57 = vadd.f32 %v103_v47, %v102_v37  ;;  %v120_v58 = vadd.f32 %v119_v49, %v118_v48  ;;  %v127_v59 = vsel %vm63_vm0, %v61_v40, 0.0 }
  0x18   :  { %v70_v60 = vadd.f32 %v69_v51, %v68_v41  ;;  %v79_v61 = vadd.f32 %v78_v52, %v77_v42  ;;  %v96_v62 = vrot.slane %v95_v53, 2  ;;  %v113_v63 = vadd.f32 %v112_v54, %v111_v44 }
  0x19   :  { %186 = vmatpush.msra.mxu0 %v137_v45  ;;  %v88_v0 = vadd.f32 %v87_v56, %v86_v46  ;;  %v105_v1 = vrot.slane %v104_v57, 2  ;;  %v121_v2 = vrot.slane %v120_v58, 4  ;;  %v128_v3 = vsel %vm63_vm0, %v62_v50, 0.0 }
  0x1a   :  { %v71_v4 = vrot.slane %v70_v60, 1  ;;  %v80_v5 = vrot.slane %v79_v61, 1  ;;  %v97_v6 = vadd.f32 %v96_v62, %v95_v53  ;;  %v114_v7 = vrot.slane %v113_v63, 2 }
  0x1b   :  { %187 = vmatpush.msra.mxu0 %v136_v55  ;;  %v89_v8 = vrot.slane %v88_v0, 1  ;;  %v106_v9 = vadd.f32 %v105_v1, %v104_v57  ;;  %v122_v10 = vadd.f32 %v121_v2, %v120_v58  ;;  %v129_v11 = vadd.f32 %v128_v3, %v127_v59 }
  0x1c   :  { %v72_v12 = vadd.f32 %v71_v4, %v70_v60  ;;  %v81_v13 = vadd.f32 %v80_v5, %v79_v61  ;;  %v98_v14 = vrot.slane %v97_v6, 1  ;;  %v115_v15 = vadd.f32 %v114_v7, %v113_v63 }
  0x1d   :  { %v90_v16 = vadd.f32 %v89_v8, %v88_v0  ;;  %v107_v17 = vrot.slane %v106_v9, 1  ;;  %v123_v18 = vrot.slane %v122_v10, 2  ;;  %v130_v19 = vrot.slane %v129_v11, 4 }
  0x1e   :  { %v99_v20 = vadd.f32 %v98_v14, %v97_v6  ;;  %v116_v21 = vrot.slane %v115_v15, 1  ;;  %v157_v22 = vsel %vm156_vm1, %v81_v13, %v72_v12  ;;  %vm168_vm7 = vcmask 1047559  }
  0x1f   :  { %v108_v23 = vadd.f32 %v107_v17, %v106_v9  ;;  %v124_v24 = vadd.f32 %v123_v18, %v122_v10  ;;  %v131_v25 = vadd.f32 %v130_v19, %v129_v11  ;;  %v159_v26 = vsel %vm158_vm2, %v90_v16, %v157_v22 }
  0x20   :  { %v117_v27 = vadd.f32 %v116_v21, %v115_v15  ;;  %v161_v28 = vsel %vm160_vm3, %v99_v20, %v159_v26 }
  0x21   :  { %v125_v29 = vrot.slane %v124_v24, 1  ;;  %v132_v30 = vrot.slane %v131_v25, 2  ;;  %v163_v31 = vsel %vm162_vm4, %v108_v23, %v161_v28 }
  0x22   :  { %v165_v34 = vsel %vm164_vm5, %v117_v27, %v163_v31 }
  0x23   :  { %v126_v32 = vadd.f32 %v125_v29, %v124_v24  ;;  %v133_v33 = vadd.f32 %v132_v30, %v131_v25 }
  0x25   :  { %v134_v35 = vrot.slane %v133_v33, 1  ;;  %v167_v36 = vsel %vm166_vm6, %v126_v32, %v165_v34 }
  0x27   :  { %v135_v37 = vadd.f32 %v134_v35, %v133_v33 }
  0x29   :  { %v169_v38 = vsel %vm168_vm7, %v135_v37, %v167_v36 }
  0x2a   :  { %211 = vmatmul.msk.f32.vlgmr.msra.gmra.mxu0 %vm63_vm0, %v169_v38 }
  0xa7   :  { %v189_v40 = vpop.f32.mrf.mxu0 }
  0xa8   :  { %v190_v41 = vadd.f32 %v217_v39, %v189_v40 }
  0xaa   :  { %192 = vst [vmem:[#allocation7] sm:$0xff] %v190_v41 }
  0xab   :  { %203 = dma.vmem_to_hbm [thread:$0]  %s199_s25, 128, %s201_s28, [#allocation4]  }
  0xac   :  { %294 = dma.done.wait [#allocation4], 128  }
  0xad   :  { %295 = vsyncadd [#allocation4], 4294967168 }
  0xae   :  { %208 = vsyncpa [#allocation3], 1 }
  0xaf   :  { %209 = vsyncpa [#allocation6], 1 }
  0xb0   :  { %210 = vsyncpa [#allocation4], 1 }

</bundles_post_ra>
